<compile_context>
chip_gen: v5e
topology: v5e:2x2
jax: 0.10.0
libtpu: 0.0.40
codegen_flags: <defaults>
</compile_context>

<pallas_src>
import jax
import jax.numpy as jnp
import numpy as np
from jax import lax
from jax.experimental import pallas as pl
from jax.experimental.pallas import tpu as pltpu  # noqa: F401  (kernel is fully VMEM-resident)


# ----------------------------------------------------------------------------
# Fused Pallas kernel: all layers, both directions, and fc+tanh in one invocation.
# Everything (sequence + all fused weights) lives in VMEM; grid is empty.
# ----------------------------------------------------------------------------
def _make_encoder_kernel(T, B, num_layers, hidden_dim):
    H = hidden_dim
    H2 = 2 * H

    def kernel(*refs):
        # refs: x, [w_ih_cat, w_hh_blk, b_cat] * L, fc_w, fc_b, out_ref, hid_ref
        idx = 0
        x_ref = refs[idx]; idx += 1
        layer_refs = []
        for _ in range(num_layers):
            layer_refs.append(refs[idx:idx + 3]); idx += 3
        fcw_ref = refs[idx]; fcb_ref = refs[idx + 1]; idx += 2
        out_ref = refs[idx]; hid_ref = refs[idx + 1]

        # Lane mask: True on the forward-direction half [0, H) of the fused 2H feature axis.
        fwd_lane = lax.broadcasted_iota(jnp.int32, (B, H2), 1) < H

        x = x_ref[...]                                     # (T*B, D_in) bf16
        h = None
        for l, (wih_ref, whh_ref, b_ref) in enumerate(layer_refs):
            w_ih = wih_ref[...]                            # (D_in, 2H) bf16 (fwd|bwd concat)
            w_hh = whh_ref[...]                            # (2H, 2H) bf16 block-diagonal
            b = b_ref[...]                                 # (1, 2H)  f32

            # Hoisted fused input projection: ONE MXU matmul per layer for the whole sequence
            # and both directions; only h @ W_hh_blk remains on the serial chain.
            p = jnp.dot(x, w_ih, preferred_element_type=jnp.float32) + b   # (T*B, 2H) f32

            # Scheduled pre-activations: at step s the fwd half needs time s, the bwd half needs
            # time T-1-s.  Pure full-width lane selects, computed off the serial chain.
            p_steps = []
            for s in range(T):
                rs = T - 1 - s
                p_steps.append(jnp.where(fwd_lane,
                                         p[s * B:(s + 1) * B, :],
                                         p[rs * B:(rs + 1) * B, :]))

            # Fused bidirectional recurrence: one (B,2H)@(2H,2H) bf16 MXU push + one f32 tanh
            # per step.  h0 = 0, so the first step skips the matmul entirely.
            h = jnp.tanh(p_steps[0])
            hs = [h]
            for s in range(1, T):
                h = jnp.tanh(p_steps[s]
                             + jnp.dot(h.astype(jnp.bfloat16), w_hh,
                                       preferred_element_type=jnp.float32))
                hs.append(h)

            # Un-schedule into time order: row-block t = [h_fwd(t) | h_bwd(t)].
            y = jnp.concatenate(
                [jnp.where(fwd_lane, hs[t], hs[T - 1 - t]) for t in range(T)], axis=0)

            if l == num_layers - 1:
                out_ref[...] = y                           # single wide aligned slab store
            else:
                # Inter-layer dropout is eval-mode identity; feed straight into next layer.
                x = y.astype(jnp.bfloat16)

        # After the last step of the last layer, h already holds [h_fwd_final | h_bwd_final],
        # so the fc is a single MXU matmul (no concat needed).
        hid_ref[...] = jnp.tanh(
            jnp.dot(h.astype(jnp.bfloat16), fcw_ref[...],
                    preferred_element_type=jnp.float32) + fcb_ref[...])

    return kernel


# ----------------------------------------------------------------------------
# Forward pass (glue in plain JAX: embedding gather, weight fusion, reshape only)
# ----------------------------------------------------------------------------
def _fuse_layer_weights(lp):
    H = lp["w_hh_f"].shape[0]
    w_ih_cat = jnp.concatenate([lp["w_ih_f"], lp["w_ih_b"]], axis=1).astype(jnp.bfloat16)
    z = jnp.zeros((H, H), jnp.float32)
    w_hh_blk = jnp.concatenate(
        [jnp.concatenate([lp["w_hh_f"], z], axis=1),
         jnp.concatenate([z, lp["w_hh_b"]], axis=1)], axis=0).astype(jnp.bfloat16)
    b_cat = jnp.concatenate([lp["b_f"], lp["b_b"]], axis=1)          # stays f32
    return w_ih_cat, w_hh_blk, b_cat


def encoder_rnn_forward(params, src):
    T, B = src.shape
    H = params["fc_w"].shape[1]
    L = len(params["rnn_layers"])

    # embedding lookup (gather) + dropout (eval -> identity)
    embedded = params["embedding"][src]                      # (T, B, E) f32
    x_flat = embedded.reshape(T * B, -1).astype(jnp.bfloat16)

    args = [x_flat]
    for lp in params["rnn_layers"]:
        args += list(_fuse_layer_weights(lp))
    args += [params["fc_w"].astype(jnp.bfloat16), params["fc_b"]]

    out_flat, hidden = pl.pallas_call(
        _make_encoder_kernel(T, B, L, H),
        out_shape=(jax.ShapeDtypeStruct((T * B, 2 * H), jnp.float32),
                   jax.ShapeDtypeStruct((B, H), jnp.float32)),
    )(*args)

    outputs = out_flat.reshape(T, B, 2 * H)                  # (T, B, 2H)
    return outputs, hidden


# ----------------------------------------------------------------------------
# Pure-JAX reference.  match_kernel_precision=True mirrors the kernel's bf16-operand /
# f32-accumulate math (tight check); False is the plain f32 module semantics (loose check).
# ----------------------------------------------------------------------------
def encoder_rnn_ref(params, src, match_kernel_precision=False):
    cast = (lambda a: a.astype(jnp.bfloat16)) if match_kernel_precision else (lambda a: a)

    def run_dir(x, w_ih, w_hh, b, reverse):
        T, B, _ = x.shape
        H = w_hh.shape[0]
        p = jnp.dot(cast(x), cast(w_ih), preferred_element_type=jnp.float32) + b  # (T,B,H)
        ps = p[::-1] if reverse else p

        def step(h, pt):
            h_new = jnp.tanh(pt + jnp.dot(cast(h), cast(w_hh),
                                          preferred_element_type=jnp.float32))
            return h_new, h_new

        hN, outs = jax.lax.scan(step, jnp.zeros((B, H), jnp.float32), ps)
        if reverse:
            outs = outs[::-1]
        return outs, hN

    x = params["embedding"][src]
    h_f = h_b = None
    for lp in params["rnn_layers"]:
        out_f, h_f = run_dir(x, lp["w_ih_f"], lp["w_hh_f"], lp["b_f"], False)
        out_b, h_b = run_dir(x, lp["w_ih_b"], lp["w_hh_b"], lp["b_b"], True)
        x = jnp.concatenate([out_f, out_b], axis=-1)
    hc = jnp.concatenate([h_f, h_b], axis=-1)
    hidden = jnp.tanh(jnp.dot(cast(hc), cast(params["fc_w"]),
                              preferred_element_type=jnp.float32) + params["fc_b"])
    return x, hidden


# ----------------------------------------------------------------------------
# Deterministic parameter init (shapes per nn.Embedding / nn.RNN / nn.Linear)
# ----------------------------------------------------------------------------
def init_params(key, input_dim, emb_dim, hidden_dim, num_layers):
    keys = jax.random.split(key, 2 + num_layers)
    k = 1.0 / np.sqrt(hidden_dim)
    params = {
        "embedding": jax.random.normal(keys[0], (input_dim, emb_dim), jnp.float32),
        "rnn_layers": [],
        # nn.Linear(hidden*2, hidden): weight stored transposed as (2H, H)
        "fc_w": jax.random.uniform(keys[1], (hidden_dim * 2, hidden_dim),
                                   jnp.float32, -k, k),
        "fc_b": jax.random.uniform(keys[1], (1, hidden_dim), jnp.float32, -k, k),
    }
    for l in range(num_layers):
        d_in = emb_dim if l == 0 else hidden_dim * 2
        kk = jax.random.split(keys[2 + l], 8)
        layer = {
            # weights stored transposed: (D_in, H) and (H, H); biases combined b_ih + b_hh
            "w_ih_f": jax.random.uniform(kk[0], (d_in, hidden_dim), jnp.float32, -k, k),
            "w_hh_f": jax.random.uniform(kk[1], (hidden_dim, hidden_dim), jnp.float32, -k, k),
            "b_f": (jax.random.uniform(kk[2], (1, hidden_dim), jnp.float32, -k, k)
                    + jax.random.uniform(kk[3], (1, hidden_dim), jnp.float32, -k, k)),
            "w_ih_b": jax.random.uniform(kk[4], (d_in, hidden_dim), jnp.float32, -k, k),
            "w_hh_b": jax.random.uniform(kk[5], (hidden_dim, hidden_dim), jnp.float32, -k, k),
            "b_b": (jax.random.uniform(kk[6], (1, hidden_dim), jnp.float32, -k, k)
                    + jax.random.uniform(kk[7], (1, hidden_dim), jnp.float32, -k, k)),
        }
        params["rnn_layers"].append(layer)
    return params


if __name__ == "__main__":
    # Small config consistent with the module
    INPUT_DIM = 50     # vocab size
    EMB_DIM = 16
    HIDDEN_DIM = 32
    NUM_LAYERS = 2
    T, B = 8, 8        # seq_len, batch (time-major; B=8 keeps all in-kernel slices sublane-aligned)

    key = jax.random.PRNGKey(0)
    kp, ks = jax.random.split(key)
    params = init_params(kp, INPUT_DIM, EMB_DIM, HIDDEN_DIM, NUM_LAYERS)
    src = jax.random.randint(ks, (T, B), 0, INPUT_DIM, dtype=jnp.int32)

    fwd = jax.jit(encoder_rnn_forward)
    outputs, hidden = fwd(params, src)
    outputs = jax.block_until_ready(outputs)
    hidden = jax.block_until_ready(hidden)

    assert outputs.shape == (T, B, 2 * HIDDEN_DIM)
    assert hidden.shape == (B, HIDDEN_DIM)

    # Tight check: reference with the same bf16-operand / f32-accumulate math as the kernel.
    m_out, m_hid = encoder_rnn_ref(params, src, match_kernel_precision=True)
    np.testing.assert_allclose(np.asarray(outputs), np.asarray(m_out), rtol=1e-3, atol=1e-3)
    np.testing.assert_allclose(np.asarray(hidden), np.asarray(m_hid), rtol=1e-3, atol=1e-3)

    # Loose check: pure-f32 module semantics; slack covers bf16 operand rounding only.
    f_out, f_hid = encoder_rnn_ref(params, src, match_kernel_precision=False)
    np.testing.assert_allclose(np.asarray(outputs), np.asarray(f_out), rtol=0.1, atol=0.1)
    np.testing.assert_allclose(np.asarray(hidden), np.asarray(f_hid), rtol=0.1, atol=0.1)

    print("KERNEL_OK")
</pallas_src>

<mosaic_0001>
module attributes {stable_mosaic.version = 11 : i64} {
  func.func @kernel(%arg0: memref<64x16xbf16, #tpu.memory_space<vmem>>, %arg1: memref<16x64xbf16, #tpu.memory_space<vmem>>, %arg2: memref<64x64xbf16, #tpu.memory_space<vmem>>, %arg3: memref<1x64xf32, #tpu.memory_space<vmem>>, %arg4: memref<64x64xbf16, #tpu.memory_space<vmem>>, %arg5: memref<64x64xbf16, #tpu.memory_space<vmem>>, %arg6: memref<1x64xf32, #tpu.memory_space<vmem>>, %arg7: memref<64x32xbf16, #tpu.memory_space<vmem>>, %arg8: memref<1x32xf32, #tpu.memory_space<vmem>>, %arg9: memref<64x64xf32, #tpu.memory_space<vmem>>, %arg10: memref<8x32xf32, #tpu.memory_space<vmem>>) attributes {dimension_semantics = [], scalar_prefetch = 0 : i64, scratch_operands = 0 : i64, tpu.core_type = #tpu.core_type<tc>} {
    %0 = tpu.iota {dimensions = array<i32: 1>} : vector<8x64xi32>
    %c32_i32 = arith.constant 32 : i32
    %1 = vector.broadcast %c32_i32 : i32 to vector<8x64xi32>
    %2 = arith.cmpi slt, %0, %1 : vector<8x64xi32>
    %c0 = arith.constant 0 : index
    %c0_0 = arith.constant 0 : index
    %3 = vector.load %arg0[%c0, %c0_0] : memref<64x16xbf16, #tpu.memory_space<vmem>>, vector<64x16xbf16>
    %c0_1 = arith.constant 0 : index
    %c0_2 = arith.constant 0 : index
    %4 = vector.load %arg1[%c0_1, %c0_2] : memref<16x64xbf16, #tpu.memory_space<vmem>>, vector<16x64xbf16>
    %c0_3 = arith.constant 0 : index
    %c0_4 = arith.constant 0 : index
    %5 = vector.load %arg2[%c0_3, %c0_4] : memref<64x64xbf16, #tpu.memory_space<vmem>>, vector<64x64xbf16>
    %c0_5 = arith.constant 0 : index
    %c0_6 = arith.constant 0 : index
    %6 = vector.load %arg3[%c0_5, %c0_6] : memref<1x64xf32, #tpu.memory_space<vmem>>, vector<1x64xf32>
    %cst = arith.constant dense<0.000000e+00> : vector<64x64xf32>
    %7 = tpu.matmul %3, %4, %cst {dimension_numbers = #tpu.dot_dimension_numbers<[1], [0], [0], [1], [0, 0, 1, 1], [], []>} : vector<64x16xbf16>, vector<16x64xbf16>, vector<64x64xf32> -> vector<64x64xf32>
    %8 = vector.broadcast %6 : vector<1x64xf32> to vector<64x64xf32>
    %9 = arith.addf %7, %8 : vector<64x64xf32>
    %10 = vector.extract_strided_slice %9 {offsets = [0, 0], sizes = [8, 64], strides = [1, 1]} : vector<64x64xf32> to vector<8x64xf32>
    %11 = vector.extract_strided_slice %9 {offsets = [56, 0], sizes = [8, 64], strides = [1, 1]} : vector<64x64xf32> to vector<8x64xf32>
    %12 = arith.select %2, %10, %11 : vector<8x64xi1>, vector<8x64xf32>
    %13 = vector.extract_strided_slice %9 {offsets = [8, 0], sizes = [8, 64], strides = [1, 1]} : vector<64x64xf32> to vector<8x64xf32>
    %14 = vector.extract_strided_slice %9 {offsets = [48, 0], sizes = [8, 64], strides = [1, 1]} : vector<64x64xf32> to vector<8x64xf32>
    %15 = arith.select %2, %13, %14 : vector<8x64xi1>, vector<8x64xf32>
    %16 = vector.extract_strided_slice %9 {offsets = [16, 0], sizes = [8, 64], strides = [1, 1]} : vector<64x64xf32> to vector<8x64xf32>
    %17 = vector.extract_strided_slice %9 {offsets = [40, 0], sizes = [8, 64], strides = [1, 1]} : vector<64x64xf32> to vector<8x64xf32>
    %18 = arith.select %2, %16, %17 : vector<8x64xi1>, vector<8x64xf32>
    %19 = vector.extract_strided_slice %9 {offsets = [24, 0], sizes = [8, 64], strides = [1, 1]} : vector<64x64xf32> to vector<8x64xf32>
    %20 = vector.extract_strided_slice %9 {offsets = [32, 0], sizes = [8, 64], strides = [1, 1]} : vector<64x64xf32> to vector<8x64xf32>
    %21 = arith.select %2, %19, %20 : vector<8x64xi1>, vector<8x64xf32>
    %22 = vector.extract_strided_slice %9 {offsets = [32, 0], sizes = [8, 64], strides = [1, 1]} : vector<64x64xf32> to vector<8x64xf32>
    %23 = vector.extract_strided_slice %9 {offsets = [24, 0], sizes = [8, 64], strides = [1, 1]} : vector<64x64xf32> to vector<8x64xf32>
    %24 = arith.select %2, %22, %23 : vector<8x64xi1>, vector<8x64xf32>
    %25 = vector.extract_strided_slice %9 {offsets = [40, 0], sizes = [8, 64], strides = [1, 1]} : vector<64x64xf32> to vector<8x64xf32>
    %26 = vector.extract_strided_slice %9 {offsets = [16, 0], sizes = [8, 64], strides = [1, 1]} : vector<64x64xf32> to vector<8x64xf32>
    %27 = arith.select %2, %25, %26 : vector<8x64xi1>, vector<8x64xf32>
    %28 = vector.extract_strided_slice %9 {offsets = [48, 0], sizes = [8, 64], strides = [1, 1]} : vector<64x64xf32> to vector<8x64xf32>
    %29 = vector.extract_strided_slice %9 {offsets = [8, 0], sizes = [8, 64], strides = [1, 1]} : vector<64x64xf32> to vector<8x64xf32>
    %30 = arith.select %2, %28, %29 : vector<8x64xi1>, vector<8x64xf32>
    %31 = vector.extract_strided_slice %9 {offsets = [56, 0], sizes = [8, 64], strides = [1, 1]} : vector<64x64xf32> to vector<8x64xf32>
    %32 = vector.extract_strided_slice %9 {offsets = [0, 0], sizes = [8, 64], strides = [1, 1]} : vector<64x64xf32> to vector<8x64xf32>
    %33 = arith.select %2, %31, %32 : vector<8x64xi1>, vector<8x64xf32>
    %34 = math.tanh %12 : vector<8x64xf32>
    %35 = arith.truncf %34 : vector<8x64xf32> to vector<8x64xbf16>
    %cst_7 = arith.constant dense<0.000000e+00> : vector<8x64xf32>
    %36 = tpu.matmul %35, %5, %cst_7 {dimension_numbers = #tpu.dot_dimension_numbers<[1], [0], [0], [1], [0, 0, 1, 1], [], []>} : vector<8x64xbf16>, vector<64x64xbf16>, vector<8x64xf32> -> vector<8x64xf32>
    %37 = arith.addf %15, %36 : vector<8x64xf32>
    %38 = math.tanh %37 : vector<8x64xf32>
    %39 = arith.truncf %38 : vector<8x64xf32> to vector<8x64xbf16>
    %cst_8 = arith.constant dense<0.000000e+00> : vector<8x64xf32>
    %40 = tpu.matmul %39, %5, %cst_8 {dimension_numbers = #tpu.dot_dimension_numbers<[1], [0], [0], [1], [0, 0, 1, 1], [], []>} : vector<8x64xbf16>, vector<64x64xbf16>, vector<8x64xf32> -> vector<8x64xf32>
    %41 = arith.addf %18, %40 : vector<8x64xf32>
    %42 = math.tanh %41 : vector<8x64xf32>
    %43 = arith.truncf %42 : vector<8x64xf32> to vector<8x64xbf16>
    %cst_9 = arith.constant dense<0.000000e+00> : vector<8x64xf32>
    %44 = tpu.matmul %43, %5, %cst_9 {dimension_numbers = #tpu.dot_dimension_numbers<[1], [0], [0], [1], [0, 0, 1, 1], [], []>} : vector<8x64xbf16>, vector<64x64xbf16>, vector<8x64xf32> -> vector<8x64xf32>
    %45 = arith.addf %21, %44 : vector<8x64xf32>
    %46 = math.tanh %45 : vector<8x64xf32>
    %47 = arith.truncf %46 : vector<8x64xf32> to vector<8x64xbf16>
    %cst_10 = arith.constant dense<0.000000e+00> : vector<8x64xf32>
    %48 = tpu.matmul %47, %5, %cst_10 {dimension_numbers = #tpu.dot_dimension_numbers<[1], [0], [0], [1], [0, 0, 1, 1], [], []>} : vector<8x64xbf16>, vector<64x64xbf16>, vector<8x64xf32> -> vector<8x64xf32>
    %49 = arith.addf %24, %48 : vector<8x64xf32>
    %50 = math.tanh %49 : vector<8x64xf32>
    %51 = arith.truncf %50 : vector<8x64xf32> to vector<8x64xbf16>
    %cst_11 = arith.constant dense<0.000000e+00> : vector<8x64xf32>
    %52 = tpu.matmul %51, %5, %cst_11 {dimension_numbers = #tpu.dot_dimension_numbers<[1], [0], [0], [1], [0, 0, 1, 1], [], []>} : vector<8x64xbf16>, vector<64x64xbf16>, vector<8x64xf32> -> vector<8x64xf32>
    %53 = arith.addf %27, %52 : vector<8x64xf32>
    %54 = math.tanh %53 : vector<8x64xf32>
    %55 = arith.truncf %54 : vector<8x64xf32> to vector<8x64xbf16>
    %cst_12 = arith.constant dense<0.000000e+00> : vector<8x64xf32>
    %56 = tpu.matmul %55, %5, %cst_12 {dimension_numbers = #tpu.dot_dimension_numbers<[1], [0], [0], [1], [0, 0, 1, 1], [], []>} : vector<8x64xbf16>, vector<64x64xbf16>, vector<8x64xf32> -> vector<8x64xf32>
    %57 = arith.addf %30, %56 : vector<8x64xf32>
    %58 = math.tanh %57 : vector<8x64xf32>
    %59 = arith.truncf %58 : vector<8x64xf32> to vector<8x64xbf16>
    %cst_13 = arith.constant dense<0.000000e+00> : vector<8x64xf32>
    %60 = tpu.matmul %59, %5, %cst_13 {dimension_numbers = #tpu.dot_dimension_numbers<[1], [0], [0], [1], [0, 0, 1, 1], [], []>} : vector<8x64xbf16>, vector<64x64xbf16>, vector<8x64xf32> -> vector<8x64xf32>
    %61 = arith.addf %33, %60 : vector<8x64xf32>
    %62 = math.tanh %61 : vector<8x64xf32>
    %63 = arith.select %2, %34, %62 : vector<8x64xi1>, vector<8x64xf32>
    %64 = arith.select %2, %38, %58 : vector<8x64xi1>, vector<8x64xf32>
    %65 = arith.select %2, %42, %54 : vector<8x64xi1>, vector<8x64xf32>
    %66 = arith.select %2, %46, %50 : vector<8x64xi1>, vector<8x64xf32>
    %67 = arith.select %2, %50, %46 : vector<8x64xi1>, vector<8x64xf32>
    %68 = arith.select %2, %54, %42 : vector<8x64xi1>, vector<8x64xf32>
    %69 = arith.select %2, %58, %38 : vector<8x64xi1>, vector<8x64xf32>
    %70 = arith.select %2, %62, %34 : vector<8x64xi1>, vector<8x64xf32>
    %71 = tpu.concatenate %63, %64, %65, %66, %67, %68, %69, %70 in 0 : vector<8x64xf32>, vector<8x64xf32>, vector<8x64xf32>, vector<8x64xf32>, vector<8x64xf32>, vector<8x64xf32>, vector<8x64xf32>, vector<8x64xf32> -> vector<64x64xf32>
    %72 = arith.truncf %71 : vector<64x64xf32> to vector<64x64xbf16>
    %c0_14 = arith.constant 0 : index
    %c0_15 = arith.constant 0 : index
    %73 = vector.load %arg4[%c0_14, %c0_15] : memref<64x64xbf16, #tpu.memory_space<vmem>>, vector<64x64xbf16>
    %c0_16 = arith.constant 0 : index
    %c0_17 = arith.constant 0 : index
    %74 = vector.load %arg5[%c0_16, %c0_17] : memref<64x64xbf16, #tpu.memory_space<vmem>>, vector<64x64xbf16>
    %c0_18 = arith.constant 0 : index
    %c0_19 = arith.constant 0 : index
    %75 = vector.load %arg6[%c0_18, %c0_19] : memref<1x64xf32, #tpu.memory_space<vmem>>, vector<1x64xf32>
    %cst_20 = arith.constant dense<0.000000e+00> : vector<64x64xf32>
    %76 = tpu.matmul %72, %73, %cst_20 {dimension_numbers = #tpu.dot_dimension_numbers<[1], [0], [0], [1], [0, 0, 1, 1], [], []>} : vector<64x64xbf16>, vector<64x64xbf16>, vector<64x64xf32> -> vector<64x64xf32>
    %77 = vector.broadcast %75 : vector<1x64xf32> to vector<64x64xf32>
    %78 = arith.addf %76, %77 : vector<64x64xf32>
    %79 = vector.extract_strided_slice %78 {offsets = [0, 0], sizes = [8, 64], strides = [1, 1]} : vector<64x64xf32> to vector<8x64xf32>
    %80 = vector.extract_strided_slice %78 {offsets = [56, 0], sizes = [8, 64], strides = [1, 1]} : vector<64x64xf32> to vector<8x64xf32>
    %81 = arith.select %2, %79, %80 : vector<8x64xi1>, vector<8x64xf32>
    %82 = vector.extract_strided_slice %78 {offsets = [8, 0], sizes = [8, 64], strides = [1, 1]} : vector<64x64xf32> to vector<8x64xf32>
    %83 = vector.extract_strided_slice %78 {offsets = [48, 0], sizes = [8, 64], strides = [1, 1]} : vector<64x64xf32> to vector<8x64xf32>
    %84 = arith.select %2, %82, %83 : vector<8x64xi1>, vector<8x64xf32>
    %85 = vector.extract_strided_slice %78 {offsets = [16, 0], sizes = [8, 64], strides = [1, 1]} : vector<64x64xf32> to vector<8x64xf32>
    %86 = vector.extract_strided_slice %78 {offsets = [40, 0], sizes = [8, 64], strides = [1, 1]} : vector<64x64xf32> to vector<8x64xf32>
    %87 = arith.select %2, %85, %86 : vector<8x64xi1>, vector<8x64xf32>
    %88 = vector.extract_strided_slice %78 {offsets = [24, 0], sizes = [8, 64], strides = [1, 1]} : vector<64x64xf32> to vector<8x64xf32>
    %89 = vector.extract_strided_slice %78 {offsets = [32, 0], sizes = [8, 64], strides = [1, 1]} : vector<64x64xf32> to vector<8x64xf32>
    %90 = arith.select %2, %88, %89 : vector<8x64xi1>, vector<8x64xf32>
    %91 = vector.extract_strided_slice %78 {offsets = [32, 0], sizes = [8, 64], strides = [1, 1]} : vector<64x64xf32> to vector<8x64xf32>
    %92 = vector.extract_strided_slice %78 {offsets = [24, 0], sizes = [8, 64], strides = [1, 1]} : vector<64x64xf32> to vector<8x64xf32>
    %93 = arith.select %2, %91, %92 : vector<8x64xi1>, vector<8x64xf32>
    %94 = vector.extract_strided_slice %78 {offsets = [40, 0], sizes = [8, 64], strides = [1, 1]} : vector<64x64xf32> to vector<8x64xf32>
    %95 = vector.extract_strided_slice %78 {offsets = [16, 0], sizes = [8, 64], strides = [1, 1]} : vector<64x64xf32> to vector<8x64xf32>
    %96 = arith.select %2, %94, %95 : vector<8x64xi1>, vector<8x64xf32>
    %97 = vector.extract_strided_slice %78 {offsets = [48, 0], sizes = [8, 64], strides = [1, 1]} : vector<64x64xf32> to vector<8x64xf32>
    %98 = vector.extract_strided_slice %78 {offsets = [8, 0], sizes = [8, 64], strides = [1, 1]} : vector<64x64xf32> to vector<8x64xf32>
    %99 = arith.select %2, %97, %98 : vector<8x64xi1>, vector<8x64xf32>
    %100 = vector.extract_strided_slice %78 {offsets = [56, 0], sizes = [8, 64], strides = [1, 1]} : vector<64x64xf32> to vector<8x64xf32>
    %101 = vector.extract_strided_slice %78 {offsets = [0, 0], sizes = [8, 64], strides = [1, 1]} : vector<64x64xf32> to vector<8x64xf32>
    %102 = arith.select %2, %100, %101 : vector<8x64xi1>, vector<8x64xf32>
    %103 = math.tanh %81 : vector<8x64xf32>
    %104 = arith.truncf %103 : vector<8x64xf32> to vector<8x64xbf16>
    %cst_21 = arith.constant dense<0.000000e+00> : vector<8x64xf32>
    %105 = tpu.matmul %104, %74, %cst_21 {dimension_numbers = #tpu.dot_dimension_numbers<[1], [0], [0], [1], [0, 0, 1, 1], [], []>} : vector<8x64xbf16>, vector<64x64xbf16>, vector<8x64xf32> -> vector<8x64xf32>
    %106 = arith.addf %84, %105 : vector<8x64xf32>
    %107 = math.tanh %106 : vector<8x64xf32>
    %108 = arith.truncf %107 : vector<8x64xf32> to vector<8x64xbf16>
    %cst_22 = arith.constant dense<0.000000e+00> : vector<8x64xf32>
    %109 = tpu.matmul %108, %74, %cst_22 {dimension_numbers = #tpu.dot_dimension_numbers<[1], [0], [0], [1], [0, 0, 1, 1], [], []>} : vector<8x64xbf16>, vector<64x64xbf16>, vector<8x64xf32> -> vector<8x64xf32>
    %110 = arith.addf %87, %109 : vector<8x64xf32>
    %111 = math.tanh %110 : vector<8x64xf32>
    %112 = arith.truncf %111 : vector<8x64xf32> to vector<8x64xbf16>
    %cst_23 = arith.constant dense<0.000000e+00> : vector<8x64xf32>
    %113 = tpu.matmul %112, %74, %cst_23 {dimension_numbers = #tpu.dot_dimension_numbers<[1], [0], [0], [1], [0, 0, 1, 1], [], []>} : vector<8x64xbf16>, vector<64x64xbf16>, vector<8x64xf32> -> vector<8x64xf32>
    %114 = arith.addf %90, %113 : vector<8x64xf32>
    %115 = math.tanh %114 : vector<8x64xf32>
    %116 = arith.truncf %115 : vector<8x64xf32> to vector<8x64xbf16>
    %cst_24 = arith.constant dense<0.000000e+00> : vector<8x64xf32>
    %117 = tpu.matmul %116, %74, %cst_24 {dimension_numbers = #tpu.dot_dimension_numbers<[1], [0], [0], [1], [0, 0, 1, 1], [], []>} : vector<8x64xbf16>, vector<64x64xbf16>, vector<8x64xf32> -> vector<8x64xf32>
    %118 = arith.addf %93, %117 : vector<8x64xf32>
    %119 = math.tanh %118 : vector<8x64xf32>
    %120 = arith.truncf %119 : vector<8x64xf32> to vector<8x64xbf16>
    %cst_25 = arith.constant dense<0.000000e+00> : vector<8x64xf32>
    %121 = tpu.matmul %120, %74, %cst_25 {dimension_numbers = #tpu.dot_dimension_numbers<[1], [0], [0], [1], [0, 0, 1, 1], [], []>} : vector<8x64xbf16>, vector<64x64xbf16>, vector<8x64xf32> -> vector<8x64xf32>
    %122 = arith.addf %96, %121 : vector<8x64xf32>
    %123 = math.tanh %122 : vector<8x64xf32>
    %124 = arith.truncf %123 : vector<8x64xf32> to vector<8x64xbf16>
    %cst_26 = arith.constant dense<0.000000e+00> : vector<8x64xf32>
    %125 = tpu.matmul %124, %74, %cst_26 {dimension_numbers = #tpu.dot_dimension_numbers<[1], [0], [0], [1], [0, 0, 1, 1], [], []>} : vector<8x64xbf16>, vector<64x64xbf16>, vector<8x64xf32> -> vector<8x64xf32>
    %126 = arith.addf %99, %125 : vector<8x64xf32>
    %127 = math.tanh %126 : vector<8x64xf32>
    %128 = arith.truncf %127 : vector<8x64xf32> to vector<8x64xbf16>
    %cst_27 = arith.constant dense<0.000000e+00> : vector<8x64xf32>
    %129 = tpu.matmul %128, %74, %cst_27 {dimension_numbers = #tpu.dot_dimension_numbers<[1], [0], [0], [1], [0, 0, 1, 1], [], []>} : vector<8x64xbf16>, vector<64x64xbf16>, vector<8x64xf32> -> vector<8x64xf32>
    %130 = arith.addf %102, %129 : vector<8x64xf32>
    %131 = math.tanh %130 : vector<8x64xf32>
    %132 = arith.select %2, %103, %131 : vector<8x64xi1>, vector<8x64xf32>
    %133 = arith.select %2, %107, %127 : vector<8x64xi1>, vector<8x64xf32>
    %134 = arith.select %2, %111, %123 : vector<8x64xi1>, vector<8x64xf32>
    %135 = arith.select %2, %115, %119 : vector<8x64xi1>, vector<8x64xf32>
    %136 = arith.select %2, %119, %115 : vector<8x64xi1>, vector<8x64xf32>
    %137 = arith.select %2, %123, %111 : vector<8x64xi1>, vector<8x64xf32>
    %138 = arith.select %2, %127, %107 : vector<8x64xi1>, vector<8x64xf32>
    %139 = arith.select %2, %131, %103 : vector<8x64xi1>, vector<8x64xf32>
    %140 = tpu.concatenate %132, %133, %134, %135, %136, %137, %138, %139 in 0 : vector<8x64xf32>, vector<8x64xf32>, vector<8x64xf32>, vector<8x64xf32>, vector<8x64xf32>, vector<8x64xf32>, vector<8x64xf32>, vector<8x64xf32> -> vector<64x64xf32>
    %c0_28 = arith.constant 0 : index
    %c0_29 = arith.constant 0 : index
    %141 = vector.load %arg9[%c0_28, %c0_29] : memref<64x64xf32, #tpu.memory_space<vmem>>, vector<64x64xf32>
    tpu.vector_store %arg9[%c0_28, %c0_29], %140 {strides = array<i32>} : memref<64x64xf32, #tpu.memory_space<vmem>>, vector<64x64xf32>,
    %142 = arith.truncf %131 : vector<8x64xf32> to vector<8x64xbf16>
    %c0_30 = arith.constant 0 : index
    %c0_31 = arith.constant 0 : index
    %143 = vector.load %arg7[%c0_30, %c0_31] : memref<64x32xbf16, #tpu.memory_space<vmem>>, vector<64x32xbf16>
    %cst_32 = arith.constant dense<0.000000e+00> : vector<8x32xf32>
    %144 = tpu.matmul %142, %143, %cst_32 {dimension_numbers = #tpu.dot_dimension_numbers<[1], [0], [0], [1], [0, 0, 1, 1], [], []>} : vector<8x64xbf16>, vector<64x32xbf16>, vector<8x32xf32> -> vector<8x32xf32>
    %c0_33 = arith.constant 0 : index
    %c0_34 = arith.constant 0 : index
    %145 = vector.load %arg8[%c0_33, %c0_34] : memref<1x32xf32, #tpu.memory_space<vmem>>, vector<1x32xf32>
    %146 = vector.broadcast %145 : vector<1x32xf32> to vector<8x32xf32>
    %147 = arith.addf %144, %146 : vector<8x32xf32>
    %148 = math.tanh %147 : vector<8x32xf32>
    %c0_35 = arith.constant 0 : index
    %c0_36 = arith.constant 0 : index
    %149 = vector.load %arg10[%c0_35, %c0_36] : memref<8x32xf32, #tpu.memory_space<vmem>>, vector<8x32xf32>
    tpu.vector_store %arg10[%c0_35, %c0_36], %148 {strides = array<i32>} : memref<8x32xf32, #tpu.memory_space<vmem>>, vector<8x32xf32>,
    return
  }
}

</mosaic_0001>

<bundles_post_ra>
// kernel: encoder_rnn_forward.1
= control target key start
LH: loop header
LB: loop body
LE: loop exit
PB: predicated region body
PF: predicated region fallthrough
CT: control target
= control target key end

     0   :  { %16 = vsyncpa [#allocation3], 0  ;;  %vm88_vm0 = vcmask 130048   ;;  %s1136_s0 = inlined_call_operand.vmem [shape: bf16[64,16], index: 0, kind: input, shape index: {}]   ;;  %s1137_s1 = inlined_call_operand.vmem [shape: bf16[16,64], index: 1, kind: input, shape index: {}]   ;;  %s1138_s2 = inlined_call_operand.vmem [shape: bf16[64,64], index: 2, kind: input, shape index: {}]   ;;  %s1139_s3 = inlined_call_operand.vmem [shape: f32[1,64], index: 3, kind: input, shape index: {}]   ;;  %s1140_s4 = inlined_call_operand.vmem [shape: bf16[64,64], index: 4, kind: input, shape index: {}]   ;;  %s1141_s5 = inlined_call_operand.vmem [shape: bf16[64,64], index: 5, kind: input, shape index: {}]   ;;  %s1142_s6 = inlined_call_operand.vmem [shape: f32[1,64], index: 6, kind: input, shape index: {}]   ;;  %s1143_s7 = inlined_call_operand.vmem [shape: bf16[64,32], index: 7, kind: input, shape index: {}]   ;;  %s1144_s8 = inlined_call_operand.vmem [shape: f32[1,32], index: 8, kind: input, shape index: {}]   ;;  %s1145_s9 = inlined_call_operand.hbm [shape: f32[64,64], index: 9, kind: output, shape index: {0}]   ;;  %s1146_s10 = inlined_call_operand.hbm [shape: f32[8,32], index: 10, kind: output, shape index: {1}]  }
   0x1   :  { %v777_v0 = vld [vmem:[%s1137_s1] sm:$0xff] }
   0x2   :  { %v773_v1 = vld [vmem:[%s1136_s0] sm:$0xff]  ;;  %108 = vmatpush.bf16.msra.mxu0 %v777_v0 }
   0x3   :  { %17 = vsyncpa [#allocation5], 0  ;;  %v774_v2 = vld [vmem:[%s1136_s0 + $0x8] sm:$0xff]  ;;  %v775_v3 = vld [vmem:[%s1136_s0 + $0x10] sm:$0xff]  ;;  %v37_v13 = vlaneseq  ;;  %vm164_vm2 = vcmask 523264   ;;  %s887_s30 = smov [#allocation2]  }
   0x4   :  { %v776_v4 = vld [vmem:[%s1136_s0 + $0x18] sm:$0xff]  ;;  %v798_v6 = vld [vmem:[%s1139_s3] ss:$0 sm:$0xff]  ;;  %v780_v14 = vld [vmem:[%s1138_s2 + $0x10] sm:$0xff]  ;;  %s636_s11 = sshll.u32 %s887_s30, 4  ;;  %s888_s12 = smov 128   ;;  %s637_s11 = int_to_ptr.vmem [resolvable:$true] %s636_s11 }
   0x5   :  { %686 = vmatmul.msk.bf16.vlgmr.msra.gmra.mxu0 %vm88_vm0, %v773_v1  ;;  %v781_v11 = vld [vmem:[%s1138_s2 + $0x18] sm:$0xff]  ;;  %v970_v16 = vand.u32 127, %v37_v13  ;;  %v779_v17 = vld [vmem:[%s1138_s2 + $0x8] sm:$0xff]  ;;  %v778_v18 = vld [vmem:[%s1138_s2] sm:$0xff]  ;;  %s638_s2 = sshll.u32 %s1145_s9, 4  ;;  %s889_s13 = smov 8   ;;  %s639_s2 = int_to_ptr.hbm [resolvable:$true] %s638_s2 }
   0x6   :  { %172 = vmatpush.bf16.msra.mxu1 %v781_v11  ;;  %191 = vmatpush.bf16.msra.mxu2 %v781_v11  ;;  %v782_v13 = vld [vmem:[%s1140_s4] sm:$0xff]  ;;  %s890_s16 = smov [#allocation4]   ;;  %s652_s9 = sshll.u32 %s1146_s10, 4  ;;  %vm630_vm3 = vcmask 261120   ;;  %s653_s9 = int_to_ptr.hbm [resolvable:$true] %s652_s9 }
   0x7   :  { %210 = vmatpush.bf16.msra.mxu3 %v781_v11  ;;  %vm39_vm1 = vcmp.lt.s32.totalorder %v970_v16, 32  ;;  %v800_v16 = vld [vmem:[%s1144_s8] ss:$0 sm:$0xff] }
   0xa   :  { %173 = vmatpush.bf16.msra.mxu1 %v780_v14  ;;  %192 = vmatpush.bf16.msra.mxu2 %v780_v14 }
   0xb   :  { %211 = vmatpush.bf16.msra.mxu3 %v780_v14 }
   0xe   :  { %174 = vmatpush.bf16.msra.mxu1 %v779_v17  ;;  %193 = vmatpush.bf16.msra.mxu2 %v779_v17 }
   0xf   :  { %212 = vmatpush.bf16.msra.mxu3 %v779_v17 }
  0x12   :  { %175 = vmatpush.bf16.msra.mxu1 %v778_v18  ;;  %194 = vmatpush.bf16.msra.mxu2 %v778_v18 }
  0x13   :  { %213 = vmatpush.bf16.msra.mxu3 %v778_v18 }
  0x15   :  { %687 = vmatmul.msk.bf16.gmra.mxu0 %vm88_vm0, %v774_v2 }
  0x16   :  { %229 = vmatpush.bf16.msrb.mxu1 %v781_v11  ;;  %248 = vmatpush.bf16.msrb.mxu2 %v781_v11 }
  0x17   :  { %267 = vmatpush.bf16.msrb.mxu3 %v781_v11 }
  0x1a   :  { %230 = vmatpush.bf16.msrb.mxu1 %v780_v14  ;;  %249 = vmatpush.bf16.msrb.mxu2 %v780_v14 }
  0x1b   :  { %268 = vmatpush.bf16.msrb.mxu3 %v780_v14 }
  0x1e   :  { %231 = vmatpush.bf16.msrb.mxu1 %v779_v17  ;;  %250 = vmatpush.bf16.msrb.mxu2 %v779_v17 }
  0x1f   :  { %269 = vmatpush.bf16.msrb.mxu3 %v779_v17 }
  0x22   :  { %232 = vmatpush.bf16.msrb.mxu1 %v778_v18  ;;  %251 = vmatpush.bf16.msrb.mxu2 %v778_v18 }
  0x23   :  { %270 = vmatpush.bf16.msrb.mxu3 %v778_v18 }
  0x25   :  { %688 = vmatmul.msk.bf16.gmra.mxu0 %vm88_vm0, %v775_v3 }
  0x35   :  { %689 = vmatmul.msk.bf16.gmra.mxu0 %vm88_vm0, %v776_v4 }
  0x82   :  { %v110_v5 = vpop.f32.mrf.mxu0 }
  0x83   :  { %v111_v32 = vadd.f32 %v798_v6, %v110_v5  ;;  %v785_v5 = vld [vmem:[%s1140_s4 + $0x18] sm:$0xff] }
  0x8a   :  { %v112_v7 = vpop.f32.mrf.mxu0 }
  0x8b   :  { %v113_v8 = vadd.f32 %v798_v6, %v112_v7 }
  0x92   :  { %v115_v9 = vpop.f32.mrf.mxu0 }
  0x93   :  { %v116_v10 = vadd.f32 %v798_v6, %v115_v9 }
  0x9a   :  { %v117_v12 = vpop.f32.mrf.mxu0 }
  0x9b   :  { %v118_v15 = vadd.f32 %v798_v6, %v117_v12  ;;  %v783_v12 = vld [vmem:[%s1140_s4 + $0x8] sm:$0xff] }
  0xa2   :  { %v120_v19 = vpop.f32.mrf.mxu0 }
  0xa3   :  { %v121_v20 = vadd.f32 %v798_v6, %v120_v19 }
  0xa5   :  { %v133_v21 = vsel %vm39_vm1, %v118_v15, %v121_v20  ;;  %v134_v22 = vsel %vm39_vm1, %v121_v20, %v118_v15 }
  0xaa   :  { %v122_v23 = vpop.f32.mrf.mxu0 }
  0xab   :  { %v123_v24 = vadd.f32 %v798_v6, %v122_v23 }
  0xad   :  { %v132_v25 = vsel %vm39_vm1, %v116_v10, %v123_v24  ;;  %v135_v26 = vsel %vm39_vm1, %v123_v24, %v116_v10 }
  0xb2   :  { %v125_v27 = vpop.f32.mrf.mxu0 }
  0xb3   :  { %v126_v28 = vadd.f32 %v798_v6, %v125_v27 }
  0xb5   :  { %v131_v29 = vsel %vm39_vm1, %v113_v8, %v126_v28  ;;  %v136_v30 = vsel %vm39_vm1, %v126_v28, %v113_v8 }
  0xba   :  { %v127_v31 = vpop.f32.mrf.mxu0 }
  0xbb   :  { %v128_v33 = vadd.f32 %v798_v6, %v127_v31  ;;  %v789_v31 = vld [vmem:[%s1141_s5 + $0x18] sm:$0xff] }
  0xbc   :  { %492 = vmatpush.bf16.msrb.mxu0 %v789_v31 }
  0xbd   :  { %v130_v34 = vsel %vm39_vm1, %v111_v32, %v128_v33  ;;  %v995_v35 = vsel %vm39_vm1, %v128_v33, %v111_v32  ;;  %v788_v33 = vld [vmem:[%s1141_s5 + $0x10] sm:$0xff] }
  0xbe   :  { %801 = vtanh.f32 %v130_v34 }
  0xc0   :  { %493 = vmatpush.bf16.msrb.mxu0 %v788_v33 }
  0xc4   :  { %v997_v36 = vpop.eup %801 }
  0xc5   :  { %v139_v37 = vpack.c.bf16 %v997_v36, %v997_v36 }
  0xc7   :  { %706 = vmatmul.msk.bf16.vlgmr.msra.gmra.mxu1 %vm164_vm2, %v139_v37 }
  0xc8   :  { %286 = vmatpush.bf16.msra.mxu1 %v781_v11  ;;  %v784_v11 = vld [vmem:[%s1140_s4 + $0x10] sm:$0xff]  ;;  %s650_s4 = sshll.u32 %s890_s16, 4  ;;  %s651_s4 = int_to_ptr.vmem [resolvable:$true] %s650_s4 }
  0xcc   :  { %287 = vmatpush.bf16.msra.mxu1 %v780_v14 }
  0xd0   :  { %288 = vmatpush.bf16.msra.mxu1 %v779_v17 }
  0xd4   :  { %289 = vmatpush.bf16.msra.mxu1 %v778_v18 }
 0x144   :  { %v177_v38 = vpop.f32.mrf.mxu1 }
 0x145   :  { %v181_v39 = vadd.f32 %v177_v38, %v131_v29 }
 0x147   :  { %803 = vtanh.f32 %v181_v39 }
 0x14c   :  { %v179_v40 = vpop.f32.mrf.mxu1 }
 0x14d   :  { %v804_v41 = vpop.eup %803 }
 0x14e   :  { %v183_v42 = vpack.c.bf16 %v804_v41, %v804_v41 }
 0x150   :  { %707 = vmatmul.msk.bf16.vlgmr.msra.gmra.mxu2 %vm164_vm2, %v183_v42 }
 0x151   :  { %369 = vmatpush.bf16.msra.mxu2 %v785_v5 }
 0x155   :  { %370 = vmatpush.bf16.msra.mxu2 %v784_v11 }
 0x159   :  { %371 = vmatpush.bf16.msra.mxu2 %v783_v12 }
 0x15d   :  { %372 = vmatpush.bf16.msra.mxu2 %v782_v13 }
 0x1d3   :  { %v196_v43 = vpop.f32.mrf.mxu2 }
 0x1d4   :  { %v200_v44 = vadd.f32 %v196_v43, %v132_v25 }
 0x1d6   :  { %805 = vtanh.f32 %v200_v44 }
 0x1db   :  { %v198_v45 = vpop.f32.mrf.mxu2 }
 0x1dc   :  { %v806_v46 = vpop.eup %805 }
 0x1dd   :  { %v202_v47 = vpack.c.bf16 %v806_v46, %v806_v46 }
 0x1df   :  { %708 = vmatmul.msk.bf16.vlgmr.msra.gmra.mxu3 %vm164_vm2, %v202_v47 }
 0x1e0   :  { %435 = vmatpush.bf16.msra.mxu3 %v789_v31 }
 0x1e4   :  { %436 = vmatpush.bf16.msra.mxu3 %v788_v33 }
 0x262   :  { %v215_v48 = vpop.f32.mrf.mxu3 }
 0x263   :  { %v219_v49 = vadd.f32 %v215_v48, %v133_v21 }
 0x265   :  { %807 = vtanh.f32 %v219_v49 }
 0x26a   :  { %v217_v50 = vpop.f32.mrf.mxu3 }
 0x26b   :  { %v808_v51 = vpop.eup %807 }
 0x26c   :  { %v221_v52 = vpack.c.bf16 %v808_v51, %v808_v51 }
 0x26e   :  { %709 = vmatmul.msk.bf16.vlgmr.msrb.gmra.mxu1 %vm164_vm2, %v221_v52 }
 0x26f   :  { %454 = vmatpush.bf16.msrb.mxu1 %v789_v31 }
 0x273   :  { %455 = vmatpush.bf16.msrb.mxu1 %v788_v33 }
 0x2eb   :  { %v234_v53 = vpop.f32.mrf.mxu1 }
 0x2ec   :  { %v238_v54 = vadd.f32 %v234_v53, %v134_v22 }
 0x2ee   :  { %809 = vtanh.f32 %v238_v54 }
 0x2f3   :  { %v236_v55 = vpop.f32.mrf.mxu1 }
 0x2f4   :  { %v810_v56 = vpop.eup %809 }
 0x2f5   :  { %v240_v57 = vpack.c.bf16 %v810_v56, %v810_v56  ;;  %v300_v62 = vsel %vm39_vm1, %v808_v51, %v810_v56  ;;  %v301_v1 = vsel %vm39_vm1, %v810_v56, %v808_v51 }
 0x2f7   :  { %710 = vmatmul.msk.bf16.vlgmr.msrb.gmra.mxu2 %vm164_vm2, %v240_v57 }
 0x37a   :  { %v253_v58 = vpop.f32.mrf.mxu2 }
 0x37b   :  { %v257_v59 = vadd.f32 %v253_v58, %v135_v26  ;;  %v799_v26 = vld [vmem:[%s1142_s6] ss:$0 sm:$0xff] }
 0x37d   :  { %811 = vtanh.f32 %v257_v59 }
 0x382   :  { %v255_v60 = vpop.f32.mrf.mxu2 }
 0x383   :  { %v812_v61 = vpop.eup %811 }
 0x384   :  { %v259_v63 = vpack.c.bf16 %v812_v61, %v812_v61  ;;  %v299_v0 = vsel %vm39_vm1, %v806_v46, %v812_v61  ;;  %v302_v2 = vsel %vm39_vm1, %v812_v61, %v806_v46 }
 0x385   :  { %v306_v3 = vpack.c.bf16 %v300_v62, %v299_v0  ;;  %v307_v4 = vpack.c.bf16 %v302_v2, %v301_v1 }
 0x386   :  { %711 = vmatmul.msk.bf16.vlgmr.msrb.gmra.mxu3 %vm164_vm2, %v259_v63 }
 0x409   :  { %v272_v6 = vpop.f32.mrf.mxu3 }
 0x40a   :  { %v276_v7 = vadd.f32 %v272_v6, %v136_v30 }
 0x40c   :  { %813 = vtanh.f32 %v276_v7 }
 0x411   :  { %v274_v8 = vpop.f32.mrf.mxu3 }
 0x412   :  { %v814_v9 = vpop.eup %813 }
 0x413   :  { %v278_v10 = vpack.c.bf16 %v814_v9, %v814_v9  ;;  %v298_v20 = vsel %vm39_vm1, %v804_v41, %v814_v9  ;;  %v303_v21 = vsel %vm39_vm1, %v814_v9, %v804_v41 }
 0x415   :  { %712 = vmatmul.msk.bf16.vlgmr.msra.gmra.mxu1 %vm164_vm2, %v278_v10 }
 0x492   :  { %v291_v14 = vpop.f32.mrf.mxu1 }
 0x493   :  { %v295_v15 = vadd.f32 %v291_v14, %v995_v35  ;;  %v787_v35 = vld [vmem:[%s1141_s5 + $0x8] sm:$0xff] }
 0x494   :  { %437 = vmatpush.bf16.msra.mxu3 %v787_v35  ;;  %456 = vmatpush.bf16.msrb.mxu1 %v787_v35 }
 0x495   :  { %815 = vtanh.f32 %v295_v15  ;;  %494 = vmatpush.bf16.msrb.mxu0 %v787_v35 }
 0x49a   :  { %v293_v17 = vpop.f32.mrf.mxu1 }
 0x49b   :  { %v816_v18 = vpop.eup %815 }
 0x49c   :  { %v297_v19 = vsel %vm39_vm1, %v997_v36, %v816_v18  ;;  %v304_v22 = vsel %vm39_vm1, %v816_v18, %v997_v36  ;;  %v786_v36 = vld [vmem:[%s1141_s5] sm:$0xff] }
 0x49d   :  { %v305_v23 = vpack.c.bf16 %v298_v20, %v297_v19  ;;  %v308_v24 = vpack.c.bf16 %v304_v22, %v303_v21  ;;  %438 = vmatpush.bf16.msra.mxu3 %v786_v36  ;;  %457 = vmatpush.bf16.msrb.mxu1 %v786_v36  ;;  %v793_v22 = vld [vmem:[%s1143_s7 + $0x18] sm:$0xff] }
 0x49e   :  { %495 = vmatpush.bf16.msrb.mxu0 %v786_v36 }
 0x49f   :  { %729 = vmatmul.msk.bf16.vlgmr.msra.gmra.mxu2 %vm164_vm2, %v305_v23 }
 0x4a1   :  { %473 = vmatpush.bf16.msrb.mxu3 %v789_v31  ;;  %511 = vmatpush.bf16.msra.mxu1 %v789_v31 }
 0x4a2   :  { %549 = vmatpush.bf16.msra.mxu0 %v789_v31 }
 0x4a5   :  { %474 = vmatpush.bf16.msrb.mxu3 %v788_v33  ;;  %512 = vmatpush.bf16.msra.mxu1 %v788_v33 }
 0x4a6   :  { %550 = vmatpush.bf16.msra.mxu0 %v788_v33 }
 0x4a9   :  { %475 = vmatpush.bf16.msrb.mxu3 %v787_v35  ;;  %513 = vmatpush.bf16.msra.mxu1 %v787_v35 }
 0x4aa   :  { %551 = vmatpush.bf16.msra.mxu0 %v787_v35 }
 0x4ad   :  { %476 = vmatpush.bf16.msrb.mxu3 %v786_v36  ;;  %514 = vmatpush.bf16.msra.mxu1 %v786_v36 }
 0x4ae   :  { %552 = vmatpush.bf16.msra.mxu0 %v786_v36 }
 0x4af   :  { %730 = vmatmul.msk.bf16.gmra.mxu2 %vm164_vm2, %v306_v3 }
 0x4bf   :  { %731 = vmatmul.msk.bf16.gmra.mxu2 %vm164_vm2, %v307_v4 }
 0x4cf   :  { %732 = vmatmul.msk.bf16.gmra.mxu2 %vm164_vm2, %v308_v24 }
 0x522   :  { %v374_v25 = vpop.f32.mrf.mxu2 }
 0x523   :  { %v375_v50 = vadd.f32 %v799_v26, %v374_v25 }
 0x52a   :  { %v376_v27 = vpop.f32.mrf.mxu2 }
 0x52b   :  { %v377_v28 = vadd.f32 %v799_v26, %v376_v27 }
 0x532   :  { %v379_v29 = vpop.f32.mrf.mxu2 }
 0x533   :  { %v380_v30 = vadd.f32 %v799_v26, %v379_v29 }
 0x53a   :  { %v381_v32 = vpop.f32.mrf.mxu2 }
 0x53b   :  { %v382_v34 = vadd.f32 %v799_v26, %v381_v32  ;;  %v790_v32 = vld [vmem:[%s1143_s7] sm:$0xff] }
 0x542   :  { %v384_v37 = vpop.f32.mrf.mxu2 }
 0x543   :  { %v385_v38 = vadd.f32 %v799_v26, %v384_v37 }
 0x545   :  { %v397_v39 = vsel %vm39_vm1, %v382_v34, %v385_v38  ;;  %v398_v40 = vsel %vm39_vm1, %v385_v38, %v382_v34 }
 0x54a   :  { %v386_v41 = vpop.f32.mrf.mxu2 }
 0x54b   :  { %v387_v42 = vadd.f32 %v799_v26, %v386_v41 }
 0x54d   :  { %v396_v43 = vsel %vm39_vm1, %v380_v30, %v387_v42  ;;  %v399_v44 = vsel %vm39_vm1, %v387_v42, %v380_v30  ;;  %v792_v30 = vld [vmem:[%s1143_s7 + $0x10] sm:$0xff] }
 0x552   :  { %v389_v45 = vpop.f32.mrf.mxu2 }
 0x553   :  { %v390_v46 = vadd.f32 %v799_v26, %v389_v45 }
 0x555   :  { %v395_v47 = vsel %vm39_vm1, %v377_v28, %v390_v46  ;;  %v400_v48 = vsel %vm39_vm1, %v390_v46, %v377_v28 }
 0x55a   :  { %v391_v49 = vpop.f32.mrf.mxu2 }
 0x55b   :  { %v392_v51 = vadd.f32 %v799_v26, %v391_v49 }
 0x55d   :  { %v394_v52 = vsel %vm39_vm1, %v375_v50, %v392_v51  ;;  %v1074_v53 = vsel %vm39_vm1, %v392_v51, %v375_v50 }
 0x55e   :  { %817 = vtanh.f32 %v394_v52 }
 0x564   :  { %v1076_v54 = vpop.eup %817 }
 0x565   :  { %v403_v55 = vpack.c.bf16 %v1076_v54, %v1076_v54 }
 0x567   :  { %749 = vmatmul.msk.bf16.vlgmr.msra.gmra.mxu3 %vm164_vm2, %v403_v55 }
 0x568   :  { %530 = vmatpush.bf16.msra.mxu3 %v789_v31  ;;  %v791_v31 = vld [vmem:[%s1143_s7 + $0x8] sm:$0xff] }
 0x56c   :  { %531 = vmatpush.bf16.msra.mxu3 %v788_v33 }
 0x570   :  { %532 = vmatpush.bf16.msra.mxu3 %v787_v35 }
 0x574   :  { %533 = vmatpush.bf16.msra.mxu3 %v786_v36 }
 0x5ea   :  { %v440_v56 = vpop.f32.mrf.mxu3 }
 0x5eb   :  { %v444_v57 = vadd.f32 %v440_v56, %v395_v47 }
 0x5ed   :  { %819 = vtanh.f32 %v444_v57 }
 0x5f2   :  { %v442_v58 = vpop.f32.mrf.mxu3 }
 0x5f3   :  { %v820_v59 = vpop.eup %819 }
 0x5f4   :  { %v446_v60 = vpack.c.bf16 %v820_v59, %v820_v59 }
 0x5f6   :  { %750 = vmatmul.msk.bf16.vlgmr.msrb.gmra.mxu1 %vm164_vm2, %v446_v60 }
 0x5f7   :  { %620 = vmatpush.bf16.msrb.mxu1 %v793_v22 }
 0x5fb   :  { %621 = vmatpush.bf16.msrb.mxu1 %v792_v30 }
 0x5ff   :  { %622 = vmatpush.bf16.msrb.mxu1 %v791_v31 }
 0x603   :  { %623 = vmatpush.bf16.msrb.mxu1 %v790_v32 }
 0x673   :  { %v459_v61 = vpop.f32.mrf.mxu1 }
 0x674   :  { %v463_v62 = vadd.f32 %v459_v61, %v396_v43 }
 0x676   :  { %821 = vtanh.f32 %v463_v62 }
 0x67b   :  { %v461_v63 = vpop.f32.mrf.mxu1 }
 0x67c   :  { %v822_v0 = vpop.eup %821 }
 0x67d   :  { %v465_v1 = vpack.c.bf16 %v822_v0, %v822_v0 }
 0x67f   :  { %751 = vmatmul.msk.bf16.vlgmr.msrb.gmra.mxu3 %vm164_vm2, %v465_v1 }
 0x702   :  { %v478_v2 = vpop.f32.mrf.mxu3 }
 0x703   :  { %v482_v3 = vadd.f32 %v478_v2, %v397_v39 }
 0x705   :  { %823 = vtanh.f32 %v482_v3 }
 0x70a   :  { %v480_v4 = vpop.f32.mrf.mxu3 }
 0x70b   :  { %v824_v5 = vpop.eup %823 }
 0x70c   :  { %v484_v6 = vpack.c.bf16 %v824_v5, %v824_v5 }
 0x70e   :  { %752 = vmatmul.msk.bf16.vlgmr.msrb.gmra.mxu0 %vm164_vm2, %v484_v6 }
 0x78b   :  { %v497_v7 = vpop.f32.mrf.mxu0 }
 0x78c   :  { %v501_v8 = vadd.f32 %v497_v7, %v398_v40 }
 0x78e   :  { %825 = vtanh.f32 %v501_v8 }
 0x793   :  { %v499_v9 = vpop.f32.mrf.mxu0 }
 0x794   :  { %v826_v10 = vpop.eup %825 }
 0x795   :  { %v563_v11 = vsel %vm39_vm1, %v824_v5, %v826_v10  ;;  %v564_v12 = vsel %vm39_vm1, %v826_v10, %v824_v5  ;;  %v503_v13 = vpack.c.bf16 %v826_v10, %v826_v10 }
 0x796   :  { %571 = vst.msk [vmem:[#allocation2 + $0x18] sm:$0xff] %vm164_vm2, %v563_v11 }
 0x797   :  { %572 = vst.msk [vmem:[#allocation2 + $0x20] sm:$0xff] %vm164_vm2, %v564_v12  ;;  %753 = vmatmul.msk.bf16.vlgmr.msra.gmra.mxu1 %vm164_vm2, %v503_v13 }
 0x814   :  { %v516_v14 = vpop.f32.mrf.mxu1 }
 0x815   :  { %v520_v15 = vadd.f32 %v516_v14, %v399_v44 }
 0x817   :  { %827 = vtanh.f32 %v520_v15 }
 0x81c   :  { %v518_v17 = vpop.f32.mrf.mxu1 }
 0x81d   :  { %v828_v18 = vpop.eup %827 }
 0x81e   :  { %v562_v19 = vsel %vm39_vm1, %v822_v0, %v828_v18  ;;  %v565_v20 = vsel %vm39_vm1, %v828_v18, %v822_v0  ;;  %v522_v21 = vpack.c.bf16 %v828_v18, %v828_v18 }
 0x81f   :  { %570 = vst.msk [vmem:[#allocation2 + $0x10] sm:$0xff] %vm164_vm2, %v562_v19 }
 0x820   :  { %573 = vst.msk [vmem:[#allocation2 + $0x28] sm:$0xff] %vm164_vm2, %v565_v20  ;;  %754 = vmatmul.msk.bf16.vlgmr.msra.gmra.mxu3 %vm164_vm2, %v522_v21 }
 0x8a3   :  { %v535_v23 = vpop.f32.mrf.mxu3 }
 0x8a4   :  { %v539_v24 = vadd.f32 %v535_v23, %v400_v48 }
 0x8a6   :  { %829 = vtanh.f32 %v539_v24 }
 0x8ab   :  { %v537_v25 = vpop.f32.mrf.mxu3 }
 0x8ac   :  { %v830_v26 = vpop.eup %829 }
 0x8ad   :  { %v561_v27 = vsel %vm39_vm1, %v820_v59, %v830_v26  ;;  %v566_v28 = vsel %vm39_vm1, %v830_v26, %v820_v59  ;;  %v541_v29 = vpack.c.bf16 %v830_v26, %v830_v26 }
 0x8ae   :  { %569 = vst.msk [vmem:[#allocation2 + $0x8] sm:$0xff] %vm164_vm2, %v561_v27 }
 0x8af   :  { %574 = vst.msk [vmem:[#allocation2 + $0x30] sm:$0xff] %vm164_vm2, %v566_v28  ;;  %755 = vmatmul.msk.bf16.vlgmr.msra.gmra.mxu0 %vm164_vm2, %v541_v29 }
 0x92c   :  { %v554_v33 = vpop.f32.mrf.mxu0 }
 0x92d   :  { %v558_v34 = vadd.f32 %v554_v33, %v1074_v53 }
 0x92f   :  { %831 = vtanh.f32 %v558_v34 }
 0x934   :  { %v556_v35 = vpop.f32.mrf.mxu0 }
 0x935   :  { %v832_v36 = vpop.eup %831 }
 0x936   :  { %v560_v37 = vsel %vm39_vm1, %v1076_v54, %v832_v36  ;;  %v567_v38 = vsel %vm39_vm1, %v832_v36, %v1076_v54  ;;  %v576_v39 = vpack.c.bf16 %v832_v36, %v832_v36 }
 0x937   :  { %568 = vst.msk [vmem:[#allocation2] sm:$0xff] %vm164_vm2, %v560_v37 }
 0x938   :  { %575 = vst.msk [vmem:[#allocation2 + $0x38] sm:$0xff] %vm164_vm2, %v567_v38  ;;  %772 = vmatmul.msk.bf16.vlgmr.msrb.gmra.mxu1 %vm164_vm2, %v576_v39 }
 0x939   :  { %644 = dma.vmem_to_hbm [thread:$0]  %s637_s11, 1024, %s639_s2, [#allocation3], %s888_s12, %s888_s12, %s889_s13  }
 0x9b5   :  { %v625_v40 = vpop.f32.mrf.mxu1 }
 0x9b6   :  { %v626_v41 = vadd.f32 %v800_v16, %v625_v40 }
 0x9b8   :  { %833 = vtanh.f32 %v626_v41 }
 0x9bd   :  { %v627_v42 = vpop.f32.mrf.mxu1 }
 0x9be   :  { %v834_v43 = vpop.eup %833 }
 0x9bf   :  { %631 = vst.msk [vmem:[#allocation4] sm:$0xff] %vm630_vm3, %v834_v43 }
 0x9c0   :  { %655 = dma.vmem_to_hbm [thread:$0]  %s651_s4, 128, %s653_s9, [#allocation5]  }
 0x9c1   :  { %883 = dma.done.wait [#allocation3], 1024  }
 0x9c2   :  { %884 = vsyncadd [#allocation3], 4294966272 }
 0x9c3   :  { %885 = dma.done.wait [#allocation5], 128  }
 0x9c4   :  { %886 = vsyncadd [#allocation5], 4294967168 }
 0x9c5   :  { %664 = vsyncpa [#allocation3], 1 }
 0x9c6   :  { %665 = vsyncpa [#allocation5], 1 }

</bundles_post_ra>
